<compile_context>
chip_gen: v6e
topology: v6e:2x2x1
jax: 0.10.0
libtpu: 0.0.40
codegen_flags: <defaults>
</compile_context>

<pallas_src>
import functools

import jax
import jax.numpy as jnp
from jax.experimental import pallas as pl
from jax.experimental.pallas import tpu as pltpu

HIDDEN = 256
LANE = 128
ROW_ALIGN = 16            # bf16 packs 2 rows / sublane -> align tiles to 16 rows


def _cdiv(a, b):
    return -(-a // b)


def _round_up(x, m):
    return (x + m - 1) // m * m


def actor_kernel(x_ref, w1_ref, b1_ref, w2_ref, b2_ref, w3_ref, b3_ref, o_ref):
    # x_ref: (TM, in_dim) f32 tile.  w*: bf16, resident.  b1/b2 bf16, b3 f32.
    x = x_ref[...].astype(jnp.bfloat16)

    # Layer 1: MXU (f32 acc) -> bf16 bias-add + ReLU (single bf16 intermediate).
    h1 = jnp.dot(x, w1_ref[...], preferred_element_type=jnp.float32)
    h1 = jnp.maximum(h1.astype(jnp.bfloat16) + b1_ref[...], 0.0)

    # Layer 2: same pattern.
    h2 = jnp.dot(h1, w2_ref[...], preferred_element_type=jnp.float32)
    h2 = jnp.maximum(h2.astype(jnp.bfloat16) + b2_ref[...], 0.0)

    # Layer 3: f32 bias add + tanh for precision, store bf16 (lane-dense vst).
    h3 = jnp.dot(h2, w3_ref[...], preferred_element_type=jnp.float32) + b3_ref[...]
    o_ref[...] = jnp.tanh(h3).astype(o_ref.dtype)


@functools.partial(jax.jit, static_argnames=("out_dim", "block_batch"))
def actor_forward(s, prepped_params, out_dim, *, block_batch=256):
    """s: (B, input_dim) float32. Returns (B, out_dim) float32."""
    w1, b1, w2, b2, w3, b3 = prepped_params
    B, in_dim = s.shape
    out_pad = w3.shape[1]

    # Tile selection: minimize padding waste, keep >=2 grid steps at moderate B.
    num_tiles = max(1, _cdiv(B, block_batch))
    tm = _round_up(_cdiv(B, num_tiles), ROW_ALIGN)
    grid_b = _cdiv(B, tm)
    b_pad = grid_b * tm
    if b_pad != B:
        s = jnp.zeros((b_pad, in_dim), s.dtype).at[:B, :].set(s)

    flops = 2 * b_pad * (in_dim * HIDDEN + HIDDEN * HIDDEN + HIDDEN * out_pad)
    bytes_accessed = (
        b_pad * in_dim * 4                                             # input (f32)
        + (in_dim * HIDDEN + HIDDEN * HIDDEN + HIDDEN * out_pad) * 2   # bf16 weights
        + 2 * HIDDEN * 2 + out_pad * 4                                 # biases
        + b_pad * out_pad * 2                                          # bf16 output
    )

    out = pl.pallas_call(
        actor_kernel,
        out_shape=jax.ShapeDtypeStruct((b_pad, out_pad), jnp.bfloat16),
        grid=(grid_b,),
        in_specs=[
            pl.BlockSpec((tm, in_dim), lambda i: (i, 0)),       # s tile (f32)
            pl.BlockSpec((in_dim, HIDDEN), lambda i: (0, 0)),   # w1 (resident)
            pl.BlockSpec((1, HIDDEN), lambda i: (0, 0)),        # b1 (bf16)
            pl.BlockSpec((HIDDEN, HIDDEN), lambda i: (0, 0)),   # w2 (resident)
            pl.BlockSpec((1, HIDDEN), lambda i: (0, 0)),        # b2 (bf16)
            pl.BlockSpec((HIDDEN, out_pad), lambda i: (0, 0)),  # w3 (padded)
            pl.BlockSpec((1, out_pad), lambda i: (0, 0)),       # b3 (padded, f32)
        ],
        out_specs=pl.BlockSpec((tm, out_pad), lambda i: (i, 0)),
        compiler_params=pltpu.CompilerParams(
            dimension_semantics=("parallel",)),                 # 2 TCs on v7x
        cost_estimate=pl.CostEstimate(
            flops=flops,
            transcendentals=b_pad * out_pad,                    # tanh
            bytes_accessed=bytes_accessed),
    )(s, w1, b1, w2, b2, w3, b3)

    # Slice padding away and restore f32 — fuses into a single tiny XLA op.
    return out[:B, :out_dim].astype(jnp.float32)


def prepare_actor_params(params):
    """One-time (out of hot path): bf16 weights, bf16 b1/b2, lane-pad w3/b3."""
    w1, b1, w2, b2, w3, b3 = params
    out_dim = w3.shape[1]
    out_pad = _round_up(out_dim, LANE)
    w3p = jnp.zeros((HIDDEN, out_pad), jnp.bfloat16).at[:, :out_dim].set(
        w3.astype(jnp.bfloat16))
    b3p = jnp.zeros((1, out_pad), jnp.float32).at[:, :out_dim].set(b3)
    return (w1.astype(jnp.bfloat16), b1.astype(jnp.bfloat16),
            w2.astype(jnp.bfloat16), b2.astype(jnp.bfloat16),
            w3p, b3p)


def init_actor_params(key, input_dim, output_dim):
    """PyTorch nn.Linear default init; weights stored transposed as (in, out)."""
    def linear_init(k, fan_in, fan_out):
        kw, kb = jax.random.split(k)
        bound = 1.0 / jnp.sqrt(jnp.float32(fan_in))
        w = jax.random.uniform(kw, (fan_in, fan_out), jnp.float32, -bound, bound)
        b = jax.random.uniform(kb, (1, fan_out), jnp.float32, -bound, bound)
        return w, b

    k1, k2, k3 = jax.random.split(key, 3)
    w1, b1 = linear_init(k1, input_dim, HIDDEN)
    w2, b2 = linear_init(k2, HIDDEN, HIDDEN)
    w3, b3 = linear_init(k3, HIDDEN, output_dim)
    return (w1, b1, w2, b2, w3, b3)


def actor_reference(s, params):
    """Pure-JAX f32 reference for correctness checking."""
    w1, b1, w2, b2, w3, b3 = params
    x = jnp.maximum(s @ w1 + b1, 0.0)
    x = jnp.maximum(x @ w2 + b2, 0.0)
    return jnp.tanh(x @ w3 + b3)


if __name__ == "__main__":
    key = jax.random.PRNGKey(0)
    k_params, k_input = jax.random.split(key)

    batch = 2
    input_dim = 8     # state dimension
    output_dim = 4    # action dimension

    params = init_actor_params(k_params, input_dim, output_dim)
    prepped = prepare_actor_params(params)
    s = jax.random.normal(k_input, (batch, input_dim), jnp.float32)

    out = jax.block_until_ready(actor_forward(s, prepped, output_dim))
    ref = actor_reference(s, params)
    assert out.shape == (batch, output_dim)
    # bf16 matmul inputs / bf16 activations+output (f32 MXU acc) -> ~1e-2 drift.
    assert jnp.allclose(out, ref, atol=5e-2, rtol=5e-2), (
        f"max abs err {float(jnp.max(jnp.abs(out - ref)))}")

    # Non-aligned batch: exercises tail padding AND a multi-step grid
    # (B=300 -> tm=160, grid=2), i.e. the pipelined / megacore path.
    s_big = jax.random.normal(k_input, (300, input_dim), jnp.float32)
    out_big = jax.block_until_ready(actor_forward(s_big, prepped, output_dim))
    ref_big = actor_reference(s_big, params)
    assert out_big.shape == (300, output_dim)
    assert jnp.allclose(out_big, ref_big, atol=5e-2, rtol=5e-2)

    # Small odd batch (tail-only path).
    s_small = jax.random.normal(k_input, (37, input_dim), jnp.float32)
    out_small = jax.block_until_ready(actor_forward(s_small, prepped, output_dim))
    ref_small = actor_reference(s_small, params)
    assert out_small.shape == (37, output_dim)
    assert jnp.allclose(out_small, ref_small, atol=5e-2, rtol=5e-2)

    print("KERNEL_OK")
</pallas_src>

<mosaic_0001>
module attributes {stable_mosaic.version = 11 : i64} {
  func.func @actor_kernel(%arg0: i32, %arg1: memref<16x8xf32, #tpu.memory_space<vmem>>, %arg2: memref<8x256xbf16, #tpu.memory_space<vmem>>, %arg3: memref<1x256xbf16, #tpu.memory_space<vmem>>, %arg4: memref<256x256xbf16, #tpu.memory_space<vmem>>, %arg5: memref<1x256xbf16, #tpu.memory_space<vmem>>, %arg6: memref<256x128xbf16, #tpu.memory_space<vmem>>, %arg7: memref<1x128xf32, #tpu.memory_space<vmem>>, %arg8: memref<16x128xbf16, #tpu.memory_space<vmem>>) attributes {dimension_semantics = [#tpu.dimension_semantics<parallel>], iteration_bounds = array<i64: 1>, scalar_prefetch = 0 : i64, scratch_operands = 0 : i64, tpu.core_type = #tpu.core_type<tc>, window_params = [{transform_indices = @transform_0, window_bounds = array<i64: 16, 8>}, {pipeline_mode = #tpu.pipeline_mode<synchronous>, transform_indices = @transform_1, window_bounds = array<i64: 8, 256>}, {pipeline_mode = #tpu.pipeline_mode<synchronous>, transform_indices = @transform_2, window_bounds = array<i64: 1, 256>}, {pipeline_mode = #tpu.pipeline_mode<synchronous>, transform_indices = @transform_3, window_bounds = array<i64: 256, 256>}, {pipeline_mode = #tpu.pipeline_mode<synchronous>, transform_indices = @transform_4, window_bounds = array<i64: 1, 256>}, {pipeline_mode = #tpu.pipeline_mode<synchronous>, transform_indices = @transform_5, window_bounds = array<i64: 256, 128>}, {pipeline_mode = #tpu.pipeline_mode<synchronous>, transform_indices = @transform_6, window_bounds = array<i64: 1, 128>}, {transform_indices = @transform_7, window_bounds = array<i64: 16, 128>}]} {
    %c0 = arith.constant 0 : index
    %c0_0 = arith.constant 0 : index
    %0 = vector.load %arg1[%c0, %c0_0] : memref<16x8xf32, #tpu.memory_space<vmem>>, vector<16x8xf32>
    %1 = arith.truncf %0 : vector<16x8xf32> to vector<16x8xbf16>
    %c0_1 = arith.constant 0 : index
    %c0_2 = arith.constant 0 : index
    %2 = vector.load %arg2[%c0_1, %c0_2] : memref<8x256xbf16, #tpu.memory_space<vmem>>, vector<8x256xbf16>
    %cst = arith.constant dense<0.000000e+00> : vector<16x256xf32>
    %3 = tpu.matmul %1, %2, %cst {dimension_numbers = #tpu.dot_dimension_numbers<[1], [0], [0], [1], [0, 0, 1, 1], [], []>} : vector<16x8xbf16>, vector<8x256xbf16>, vector<16x256xf32> -> vector<16x256xf32>
    %4 = arith.truncf %3 : vector<16x256xf32> to vector<16x256xbf16>
    %c0_3 = arith.constant 0 : index
    %c0_4 = arith.constant 0 : index
    %5 = vector.load %arg3[%c0_3, %c0_4] : memref<1x256xbf16, #tpu.memory_space<vmem>>, vector<1x256xbf16>
    %6 = vector.broadcast %5 : vector<1x256xbf16> to vector<16x256xbf16>
    %7 = arith.addf %4, %6 : vector<16x256xbf16>
    %cst_5 = arith.constant 0.000000e+00 : bf16
    %8 = vector.broadcast %cst_5 : bf16 to vector<16x256xbf16>
    %9 = arith.maximumf %7, %8 : vector<16x256xbf16>
    %c0_6 = arith.constant 0 : index
    %c0_7 = arith.constant 0 : index
    %10 = vector.load %arg4[%c0_6, %c0_7] : memref<256x256xbf16, #tpu.memory_space<vmem>>, vector<256x256xbf16>
    %cst_8 = arith.constant dense<0.000000e+00> : vector<16x256xf32>
    %11 = tpu.matmul %9, %10, %cst_8 {dimension_numbers = #tpu.dot_dimension_numbers<[1], [0], [0], [1], [0, 0, 1, 1], [], []>} : vector<16x256xbf16>, vector<256x256xbf16>, vector<16x256xf32> -> vector<16x256xf32>
    %12 = arith.truncf %11 : vector<16x256xf32> to vector<16x256xbf16>
    %c0_9 = arith.constant 0 : index
    %c0_10 = arith.constant 0 : index
    %13 = vector.load %arg5[%c0_9, %c0_10] : memref<1x256xbf16, #tpu.memory_space<vmem>>, vector<1x256xbf16>
    %14 = vector.broadcast %13 : vector<1x256xbf16> to vector<16x256xbf16>
    %15 = arith.addf %12, %14 : vector<16x256xbf16>
    %cst_11 = arith.constant 0.000000e+00 : bf16
    %16 = vector.broadcast %cst_11 : bf16 to vector<16x256xbf16>
    %17 = arith.maximumf %15, %16 : vector<16x256xbf16>
    %c0_12 = arith.constant 0 : index
    %c0_13 = arith.constant 0 : index
    %18 = vector.load %arg6[%c0_12, %c0_13] : memref<256x128xbf16, #tpu.memory_space<vmem>>, vector<256x128xbf16>
    %cst_14 = arith.constant dense<0.000000e+00> : vector<16x128xf32>
    %19 = tpu.matmul %17, %18, %cst_14 {dimension_numbers = #tpu.dot_dimension_numbers<[1], [0], [0], [1], [0, 0, 1, 1], [], []>} : vector<16x256xbf16>, vector<256x128xbf16>, vector<16x128xf32> -> vector<16x128xf32>
    %c0_15 = arith.constant 0 : index
    %c0_16 = arith.constant 0 : index
    %20 = vector.load %arg7[%c0_15, %c0_16] : memref<1x128xf32, #tpu.memory_space<vmem>>, vector<1x128xf32>
    %21 = vector.broadcast %20 : vector<1x128xf32> to vector<16x128xf32>
    %22 = arith.addf %19, %21 : vector<16x128xf32>
    %23 = math.tanh %22 : vector<16x128xf32>
    %24 = arith.truncf %23 : vector<16x128xf32> to vector<16x128xbf16>
    %c0_17 = arith.constant 0 : index
    %c0_18 = arith.constant 0 : index
    %25 = vector.load %arg8[%c0_17, %c0_18] : memref<16x128xbf16, #tpu.memory_space<vmem>>, vector<16x128xbf16>
    tpu.vector_store %arg8[%c0_17, %c0_18], %24 {strides = array<i32>} : memref<16x128xbf16, #tpu.memory_space<vmem>>, vector<16x128xbf16>,
    return
  }
  func.func @transform_0(%arg0: i32) -> (i32, i32) {
    %c0_i32 = arith.constant 0 : i32
    %c0_i32_0 = arith.constant 0 : i32
    return %arg0, %c0_i32 : i32, i32
  }
  func.func @transform_1(%arg0: i32) -> (i32, i32) {
    %c0_i32 = arith.constant 0 : i32
    %c0_i32_0 = arith.constant 0 : i32
    %c0_i32_1 = arith.constant 0 : i32
    return %c0_i32, %c0_i32_0 : i32, i32
  }
  func.func @transform_2(%arg0: i32) -> (i32, i32) {
    %c0_i32 = arith.constant 0 : i32
    %c0_i32_0 = arith.constant 0 : i32
    %c0_i32_1 = arith.constant 0 : i32
    return %c0_i32, %c0_i32_0 : i32, i32
  }
  func.func @transform_3(%arg0: i32) -> (i32, i32) {
    %c0_i32 = arith.constant 0 : i32
    %c0_i32_0 = arith.constant 0 : i32
    %c0_i32_1 = arith.constant 0 : i32
    return %c0_i32, %c0_i32_0 : i32, i32
  }
  func.func @transform_4(%arg0: i32) -> (i32, i32) {
    %c0_i32 = arith.constant 0 : i32
    %c0_i32_0 = arith.constant 0 : i32
    %c0_i32_1 = arith.constant 0 : i32
    return %c0_i32, %c0_i32_0 : i32, i32
  }
  func.func @transform_5(%arg0: i32) -> (i32, i32) {
    %c0_i32 = arith.constant 0 : i32
    %c0_i32_0 = arith.constant 0 : i32
    %c0_i32_1 = arith.constant 0 : i32
    return %c0_i32, %c0_i32_0 : i32, i32
  }
  func.func @transform_6(%arg0: i32) -> (i32, i32) {
    %c0_i32 = arith.constant 0 : i32
    %c0_i32_0 = arith.constant 0 : i32
    %c0_i32_1 = arith.constant 0 : i32
    return %c0_i32, %c0_i32_0 : i32, i32
  }
  func.func @transform_7(%arg0: i32) -> (i32, i32) {
    %c0_i32 = arith.constant 0 : i32
    %c0_i32_0 = arith.constant 0 : i32
    return %arg0, %c0_i32 : i32, i32
  }
}

</mosaic_0001>

<bundles_post_ra>
// kernel: actor_forward.1
= control target key start
LH: loop header
LB: loop body
LE: loop exit
PB: predicated region body
PF: predicated region fallthrough
CT: control target
= control target key end

     0   :  { %12 = vsyncpa [#allocation3], 0  ;;  %s923_s0 = inlined_call_operand.vmem [shape: f32[16,8], index: 0, kind: input, shape index: {}]   ;;  %s924_s1 = inlined_call_operand.vmem [shape: bf16[8,256], index: 1, kind: input, shape index: {}]   ;;  %s925_s2 = inlined_call_operand.vmem [shape: bf16[1,256], index: 2, kind: input, shape index: {}]   ;;  %s926_s3 = inlined_call_operand.hbm [shape: bf16[256,256], index: 3, kind: input, shape index: {}]   ;;  %s927_s4 = inlined_call_operand.vmem [shape: bf16[1,256], index: 4, kind: input, shape index: {}]   ;;  %s928_s5 = inlined_call_operand.hbm [shape: bf16[256,128], index: 5, kind: input, shape index: {}]   ;;  %s929_s6 = inlined_call_operand.vmem [shape: f32[1,128], index: 6, kind: input, shape index: {}]   ;;  %s930_s7 = inlined_call_operand.vmem [shape: bf16[16,128], index: 7, kind: output, shape index: {}]  }
   0x1   :  { %13 = vsyncpa [#allocation5], 0  ;;  %s843_s24 = smov [#allocation2]  }
   0x2   :  { %s25_s25 = sshll.u32 %s843_s24, 4  ;;  %s26_s25 = int_to_ptr.vmem [resolvable:$true] %s25_s25 }
   0x3   :  { %s807_s26 = scalar_lea.vmem %s26_s25, 4096  ;;  %p812_p1 = scmp.lt.s32.totalorder %s26_s25, %s26_s25 }
   0x4   :  { %p808_p0 = scmp.ne.s32.totalorder %s26_s25, %s807_s26  ;;  %p813_p2 = scmp.lt.s32.totalorder %s807_s26, %s807_s26 }
   0x6   :  { %p814_p3 = por %p813_p2, %p812_p1 }
   0x8   :  { %p815_p4 = pnand %p814_p3, %p808_p0 }
   0xa   :  { %818 = shalt.err (!%p815_p4)
}
   0xb   :  { %s844_s27 = smov 128   ;;  %s845_s28 = smov 8  }
   0xc   :  { %31 = dma.hbm_to_vmem [thread:$0]  %s926_s3, 4096, %s26_s25, [#allocation3], %s844_s27, %s844_s27, %s845_s28  }
   0xd   :  { %s846_s8 = smov [#allocation4]  }
   0xe   :  { %s39_s9 = sshll.u32 %s846_s8, 4  ;;  %s40_s9 = int_to_ptr.vmem [resolvable:$true] %s39_s9 }
   0xf   :  { %s827_s10 = scalar_lea.vmem %s40_s9, 2048  ;;  %p832_p6 = scmp.lt.s32.totalorder %s40_s9, %s40_s9 }
  0x10   :  { %p828_p5 = scmp.ne.s32.totalorder %s40_s9, %s827_s10  ;;  %p833_p7 = scmp.lt.s32.totalorder %s827_s10, %s827_s10 }
  0x12   :  { %p834_p8 = por %p833_p7, %p832_p6 }
  0x14   :  { %p835_p9 = pnand %p834_p8, %p828_p5 }
  0x16   :  { %838 = shalt.err (!%p835_p9)
}
  0x17   :  { %s847_s11 = smov 64   ;;  %s848_s12 = smov 4  }
  0x18   :  { %45 = dma.hbm_to_vmem [thread:$0]  %s928_s5, 2048, %s40_s9, [#allocation5], %s847_s11, %s847_s11, %s848_s12  }
  0x19   :  { %839 = dma.done.wait [#allocation3], 4096  }
  0x1a   :  { %840 = vsyncadd [#allocation3], 4294963200 }
  0x1b   :  { %841 = dma.done.wait [#allocation5], 2048  }
  0x1c   :  { %842 = vsyncadd [#allocation5], 4294965248  ;;  %v849_v0 = vmov 0   ;;  %v58_v1 = vld [vmem:[%s924_s1] sm:$0xff]  ;;  %vm68_vm0 = vcmask 1043456   ;;  %v56_v3 = vld [vmem:[%s923_s0 + $0x8] sm:$0xff]  ;;  %v133_v52 = vlaneseq }
  0x1d   :  { %107 = vmatprep.mubr.bf16.mxu0 %v849_v0  ;;  %v55_v2 = vld [vmem:[%s923_s0] sm:$0xff]  ;;  %v636_v4 = vcombine.high %v58_v1, %v58_v1  ;;  %v635_v5 = vcombine.low %v58_v1, %v58_v1  ;;  %v731_v6 = vld [vmem:[#allocation2 + $0x74] ss:$8 sps:$4 sm:$0xff]   ;;  %v733_v7 = vld [vmem:[#allocation2 + $0x70] ss:$8 sps:$4 sm:$0xff]   ;;  %vm64_vm1 = vcmask 64512  }
  0x1e   :  { %v57_v9 = vpack.c.bf16 %v56_v3, %v55_v2  ;;  %354 = vmatprep.subr.bf16.mxu1 %v731_v6  ;;  %v734_v10 = vld [vmem:[#allocation2 + $0x64] ss:$8 sps:$4 sm:$0xff]   ;;  %v736_v11 = vld [vmem:[#allocation2 + $0x60] ss:$8 sps:$4 sm:$0xff]   ;;  %v737_v12 = vld [vmem:[#allocation2 + $0x54] ss:$8 sps:$4 sm:$0xff]  }
  0x1f   :  { %637 = vmatprep.subr.msk.bf16.mxu0 %vm68_vm0, %v636_v4  ;;  %v70_v8 = vsel %vm68_vm0, %v635_v5, 0  ;;  %355 = vmatpush1.bf16.msra.mxu1 %v733_v7  ;;  %v739_v13 = vld [vmem:[#allocation2 + $0x50] ss:$8 sps:$4 sm:$0xff]   ;;  %v740_v14 = vld [vmem:[#allocation2 + $0x44] ss:$8 sps:$4 sm:$0xff]   ;;  %v134_v54 = vshrl.u32 %v133_v52, 7 }
  0x20   :  { %90 = vmatpush1.bf16.msra.mxu0 %v70_v8  ;;  %356 = vmatprep.subr.bf16.mxu1 %v734_v10  ;;  %v742_v15 = vld [vmem:[#allocation2 + $0x40] ss:$8 sps:$4 sm:$0xff]   ;;  %v743_v16 = vld [vmem:[#allocation2 + $0x34] ss:$8 sps:$4 sm:$0xff]   ;;  %v745_v17 = vld [vmem:[#allocation2 + $0x30] ss:$8 sps:$4 sm:$0xff]  }
  0x21   :  { %v746_v18 = vld [vmem:[#allocation2 + $0x24] ss:$8 sps:$4 sm:$0xff]   ;;  %v748_v19 = vld [vmem:[#allocation2 + $0x20] ss:$8 sps:$4 sm:$0xff]   ;;  %v749_v20 = vld [vmem:[#allocation2 + $0x14] ss:$8 sps:$4 sm:$0xff]  }
  0x22   :  { %v751_v21 = vld [vmem:[#allocation2 + $0x10] ss:$8 sps:$4 sm:$0xff]   ;;  %v752_v22 = vld [vmem:[#allocation2 + $0x4] ss:$8 sps:$4 sm:$0xff]   ;;  %v754_v23 = vld [vmem:[#allocation2] ss:$8 sps:$4 sm:$0xff]  }
  0x23   :  { %638 = vmatmul.mubr.msk.bf16.vlgmr.msra.gmra.mxu0 %vm64_vm1, %v57_v9  ;;  %357 = vmatpush1.bf16.msra.mxu1 %v736_v11  ;;  %v755_v24 = vld [vmem:[#allocation2 + $0xf4] ss:$8 sps:$4 sm:$0xff]   ;;  %v757_v25 = vld [vmem:[#allocation2 + $0xf0] ss:$8 sps:$4 sm:$0xff]   ;;  %v758_v26 = vld [vmem:[#allocation2 + $0xe4] ss:$8 sps:$4 sm:$0xff]  }
  0x24   :  { %358 = vmatprep.subr.bf16.mxu1 %v737_v12  ;;  %v760_v27 = vld [vmem:[#allocation2 + $0xe0] ss:$8 sps:$4 sm:$0xff]   ;;  %v761_v28 = vld [vmem:[#allocation2 + $0xd4] ss:$8 sps:$4 sm:$0xff]   ;;  %v763_v29 = vld [vmem:[#allocation2 + $0xd0] ss:$8 sps:$4 sm:$0xff]  }
  0x25   :  { %v764_v30 = vld [vmem:[#allocation2 + $0xc4] ss:$8 sps:$4 sm:$0xff]   ;;  %v766_v31 = vld [vmem:[#allocation2 + $0xc0] ss:$8 sps:$4 sm:$0xff]   ;;  %v767_v32 = vld [vmem:[#allocation2 + $0xb4] ss:$8 sps:$4 sm:$0xff]  }
  0x26   :  { %v769_v33 = vld [vmem:[#allocation2 + $0xb0] ss:$8 sps:$4 sm:$0xff]   ;;  %v770_v34 = vld [vmem:[#allocation2 + $0xa4] ss:$8 sps:$4 sm:$0xff]   ;;  %v772_v35 = vld [vmem:[#allocation2 + $0xa0] ss:$8 sps:$4 sm:$0xff]  }
  0x27   :  { %359 = vmatpush1.bf16.msra.mxu1 %v739_v13  ;;  %v773_v36 = vld [vmem:[#allocation2 + $0x94] ss:$8 sps:$4 sm:$0xff]   ;;  %v775_v37 = vld [vmem:[#allocation2 + $0x90] ss:$8 sps:$4 sm:$0xff]   ;;  %v776_v38 = vld [vmem:[#allocation2 + $0x84] ss:$8 sps:$4 sm:$0xff]  }
  0x28   :  { %360 = vmatprep.subr.bf16.mxu1 %v740_v14  ;;  %v778_v39 = vld [vmem:[#allocation2 + $0x80] ss:$8 sps:$4 sm:$0xff]   ;;  %v779_v40 = vld [vmem:[#allocation4 + $0x78] sm:$0xff]   ;;  %v781_v42 = vld [vmem:[#allocation4 + $0x70] sm:$0xff]   ;;  %v850_v50 = vmov 1966171168  }
  0x29   :  { %v780_v41 = vld [vmem:[#allocation4 + $0x38] sm:$0xff]   ;;  %699 = vmatprep.subr.bf16.mxu0 %v779_v40  ;;  %v782_v43 = vld [vmem:[#allocation4 + $0x30] sm:$0xff]   ;;  %v783_v44 = vld [vmem:[#allocation4 + $0x68] sm:$0xff]   ;;  %v131_v51 = vunpack.c.l.s4 %v850_v50  ;;  %v149_v62 = vsub.s32 0, %v134_v54 }
  0x2a   :  { %700 = vmatpush3.bf16.msra.mxu0 %v780_v41  ;;  %v784_v45 = vld [vmem:[#allocation4 + $0x28] sm:$0xff]   ;;  %v785_v46 = vld [vmem:[#allocation4 + $0x60] sm:$0xff]   ;;  %v787_v48 = vld [vmem:[#allocation4 + $0x58] sm:$0xff]  }
  0x2b   :  { %361 = vmatpush1.bf16.msra.mxu1 %v742_v15  ;;  %701 = vmatprep.subr.bf16.mxu0 %v781_v42  ;;  %v786_v47 = vld [vmem:[#allocation4 + $0x20] sm:$0xff]   ;;  %v788_v49 = vld [vmem:[#allocation4 + $0x18] sm:$0xff]   ;;  %v132_v53 = vunpack.c.0.s8 %v131_v51  ;;  %v789_v12 = vld [vmem:[#allocation4 + $0x50] sm:$0xff]  }
  0x2c   :  { %362 = vmatprep.subr.bf16.mxu1 %v743_v16  ;;  %v639_v55 = vld.sshfl [vmem:[%s925_s2] sm:$0x11 pattern:$0x75316420]  ;;  %v790_v13 = vld [vmem:[#allocation4 + $0x10] sm:$0xff]   ;;  %v791_v14 = vld [vmem:[#allocation4 + $0x48] sm:$0xff]  }
  0x2d   :  { %v135_v56 = vsub.s32 %v132_v53, %v134_v54  ;;  %v129_v57 = vcombine.high %v639_v55, %v639_v55  ;;  %v792_v15 = vld [vmem:[#allocation4 + $0x8] sm:$0xff]   ;;  %v793_v16 = vld [vmem:[#allocation4 + $0x40] sm:$0xff]  }
  0x2e   :  { %702 = vmatpush3.bf16.msra.mxu0 %v782_v43 }
  0x2f   :  { %363 = vmatpush1.bf16.msra.mxu1 %v745_v17  ;;  %703 = vmatprep.subr.bf16.mxu0 %v783_v44  ;;  %v136_v58 = vrot.slane %v639_v55, %v135_v56  ;;  %v143_v59 = vrot.slane %v129_v57, %v135_v56  ;;  %v794_v17 = vld [vmem:[#allocation4] sm:$0xff]  }
  0x30   :  { %364 = vmatprep.subr.bf16.mxu1 %v746_v18  ;;  %v672_v18 = vld.sshfl [vmem:[%s927_s4] sm:$0x11 pattern:$0x75316420] }
  0x31   :  { %v145_v61 = vpack.i.b16 %v136_v58, %v136_v58  ;;  %v152_v63 = vpack.i.b16 %v143_v59, %v143_v59 }
  0x32   :  { %704 = vmatpush3.bf16.msra.mxu0 %v784_v45 }
  0x33   :  { %365 = vmatpush1.bf16.msra.mxu1 %v748_v19  ;;  %705 = vmatprep.subr.bf16.mxu0 %v785_v46  ;;  %v150_v3 = vrot.slane %v145_v61, %v149_v62  ;;  %v157_v5 = vrot.slane %v152_v63, %v149_v62  ;;  %v408_v19 = vcombine.high %v672_v18, %v672_v18 }
  0x34   :  { %366 = vmatprep.subr.bf16.mxu1 %v749_v20  ;;  %v415_v20 = vrot.slane %v672_v18, %v135_v56 }
  0x36   :  { %706 = vmatpush3.bf16.msra.mxu0 %v786_v47 }
  0x37   :  { %367 = vmatpush1.bf16.msra.mxu1 %v751_v21  ;;  %707 = vmatprep.subr.bf16.mxu0 %v787_v48  ;;  %v422_v21 = vrot.slane %v408_v19, %v135_v56 }
  0x38   :  { %368 = vmatprep.subr.bf16.mxu1 %v752_v22 }
  0x3a   :  { %708 = vmatpush3.bf16.msra.mxu0 %v788_v49 }
  0x3b   :  { %369 = vmatpush1.bf16.msra.mxu1 %v754_v23  ;;  %709 = vmatprep.subr.bf16.mxu0 %v789_v12  ;;  %v424_v23 = vpack.i.b16 %v415_v20, %v415_v20 }
  0x3c   :  { %370 = vmatprep.subr.bf16.mxu1 %v755_v24  ;;  %v431_v24 = vpack.i.b16 %v422_v21, %v422_v21 }
  0x3e   :  { %710 = vmatpush3.bf16.msra.mxu0 %v790_v13 }
  0x3f   :  { %371 = vmatpush2.bf16.msra.mxu1 %v757_v25  ;;  %711 = vmatprep.subr.bf16.mxu0 %v791_v14 }
  0x40   :  { %372 = vmatprep.subr.bf16.mxu1 %v758_v26 }
  0x42   :  { %712 = vmatpush3.bf16.msra.mxu0 %v792_v15 }
  0x43   :  { %373 = vmatpush2.bf16.msra.mxu1 %v760_v27  ;;  %713 = vmatprep.subr.bf16.mxu0 %v793_v16  ;;  %v429_v27 = vrot.slane %v424_v23, %v149_v62 }
  0x44   :  { %374 = vmatprep.subr.bf16.mxu1 %v761_v28 }
  0x46   :  { %714 = vmatpush3.bf16.msra.mxu0 %v794_v17 }
  0x47   :  { %375 = vmatpush2.bf16.msra.mxu1 %v763_v29  ;;  %v436_v29 = vrot.slane %v431_v24, %v149_v62 }
  0x48   :  { %376 = vmatprep.subr.bf16.mxu1 %v764_v30 }
  0x4b   :  { %377 = vmatpush2.bf16.msra.mxu1 %v766_v31 }
  0x4c   :  { %378 = vmatprep.subr.bf16.mxu1 %v767_v32 }
  0x4f   :  { %379 = vmatpush2.bf16.msra.mxu1 %v769_v33 }
  0x50   :  { %380 = vmatprep.subr.bf16.mxu1 %v770_v34 }
  0x53   :  { %381 = vmatpush2.bf16.msra.mxu1 %v772_v35 }
  0x54   :  { %382 = vmatprep.subr.bf16.mxu1 %v773_v36 }
  0x57   :  { %383 = vmatpush2.bf16.msra.mxu1 %v775_v37 }
  0x58   :  { %384 = vmatprep.subr.bf16.mxu1 %v776_v38  ;;  %v673_v38 = vld [vmem:[%s929_s6] ss:$0 sm:$0xff] }
  0x5b   :  { %385 = vmatpush2.bf16.msra.mxu1 %v778_v39 }
  0xe3   :  { %v109_v60 = vpop.f32.mrf.mxu0 }
  0xe5   :  { %v111_v1 = vpop.f32.mrf.mxu0 }
  0xe7   :  { %v113_v2 = vpop.f32.mrf.mxu0 }
  0xe8   :  { %v118_v4 = vpack.c.bf16 %v113_v2, %v109_v60 }
  0xe9   :  { %v115_v6 = vpop.f32.mrf.mxu0 }
  0xea   :  { %v119_v7 = vpack.c.bf16 %v115_v6, %v111_v1  ;;  %v158_v8 = vadd.bf16 %v150_v3, %v118_v4 }
  0xec   :  { %v159_v9 = vadd.bf16 %v157_v5, %v119_v7  ;;  %v160_v11 = vmax.bf16 %v849_v0, %v158_v8 }
  0xee   :  { %v161_v10 = vmax.bf16 %v849_v0, %v159_v9 }
  0xf0   :  { %386 = vmatprep.mubr.bf16.mxu1 %v161_v10 }
  0xf1   :  { %387 = vmatmul.mubr.bf16.vlgmr.msra.gmra.mxu1 %v160_v11 }
 0x1b1   :  { %v388_v22 = vpop.f32.mrf.mxu1 }
 0x1b3   :  { %v390_v25 = vpop.f32.mrf.mxu1 }
 0x1b5   :  { %v392_v26 = vpop.f32.mrf.mxu1 }
 0x1b6   :  { %v397_v28 = vpack.c.bf16 %v392_v26, %v388_v22 }
 0x1b7   :  { %v394_v30 = vpop.f32.mrf.mxu1 }
 0x1b8   :  { %v398_v31 = vpack.c.bf16 %v394_v30, %v390_v25  ;;  %v437_v32 = vadd.bf16 %v429_v27, %v397_v28 }
 0x1ba   :  { %v438_v33 = vadd.bf16 %v436_v29, %v398_v31  ;;  %v439_v35 = vmax.bf16 %v849_v0, %v437_v32 }
 0x1bc   :  { %v440_v34 = vmax.bf16 %v849_v0, %v438_v33 }
 0x1be   :  { %608 = vmatprep.mubr.bf16.mxu0 %v440_v34 }
 0x1bf   :  { %609 = vmatmul.mubr.bf16.vlgmr.msra.gmra.mxu0 %v439_v35 }
 0x27f   :  { %v715_v36 = vpop.f32.mrf.mxu0 }
 0x281   :  { %v716_v37 = vpop.f32.mrf.mxu0 }
 0x282   :  { %v717_v39 = vadd.f32 %v716_v37, %v715_v36 }
 0x283   :  { %v718_v40 = vpop.f32.mrf.mxu0 }
 0x284   :  { %v611_v41 = vadd.f32 %v717_v39, %v673_v38 }
 0x285   :  { %v719_v42 = vpop.f32.mrf.mxu0 }
 0x286   :  { %v720_v43 = vadd.f32 %v719_v42, %v718_v40  ;;  %795 = vtanh.f32 %v611_v41 }
 0x288   :  { %v614_v44 = vadd.f32 %v720_v43, %v673_v38 }
 0x28a   :  { %797 = vtanh.f32 %v614_v44 }
 0x293   :  { %v796_v45 = vpop.eup %795 }
 0x297   :  { %v798_v46 = vpop.eup %797 }
 0x298   :  { %v697_v47 = vpack.c.bf16 %v798_v46, %v796_v45 }
 0x29a   :  { %698 = vst [vmem:[%s930_s7] sm:$0xff] %v697_v47  }
 0x29b   :  { %633 = vsyncpa [#allocation3], 1 }
 0x29c   :  { %634 = vsyncpa [#allocation5], 1 }

</bundles_post_ra>
